<compile_context>
chip_gen: v6e
topology: v6e:2x2x1
jax: 0.10.0
libtpu: 0.0.40
codegen_flags: <defaults>
</compile_context>

<pallas_src>
import math

import jax
import jax.numpy as jnp
from jax.experimental import pallas as pl
from jax.experimental.pallas import tpu as pltpu


def _kernel_pe_inline(f_ref, w_ref, freq_ref, phase_ref, o_ref):
    """One (TL, dModel) output tile: in-kernel sinusoidal PE + one MXU dot."""
    tl, d_model = o_ref.shape
    # Absolute sequence positions for this tile (grid axis 0 = L-tile axis).
    row = jax.lax.broadcasted_iota(jnp.int32, (tl, d_model), 0).astype(jnp.float32)
    pos = row + (pl.program_id(0) * tl).astype(jnp.float32)          # (TL, dModel)
    # pe[:, 2i] = sin(pos*f_i); pe[:, 2i+1] = cos(pos*f_i) = sin(pos*f_i + pi/2)
    acc = jnp.sin(pos * freq_ref[...] + phase_ref[...])               # f32, EUP
    # TokenEmbedding (circular conv, taps folded) + TimeFeatureEmbedding: one dot.
    acc = acc + jnp.dot(f_ref[...], w_ref[...],
                        preferred_element_type=jnp.float32)
    o_ref[...] = acc.astype(o_ref.dtype)


def _kernel_pe_table(f_ref, w_ref, pe_ref, o_ref):
    """Fallback: PE streamed as a table (amortized to one read per L-tile)."""
    acc = pe_ref[...].astype(jnp.float32)
    acc = acc + jnp.dot(f_ref[...], w_ref[...],
                        preferred_element_type=jnp.float32)
    o_ref[...] = acc.astype(o_ref.dtype)


def _positional_embedding(seq_len, d_model, dtype=jnp.float32):
    """Sinusoidal PE identical to the PyTorch PositionalEmbedding buffer."""
    position = jnp.arange(seq_len, dtype=jnp.float32)[:, None]              # (L, 1)
    div_term = jnp.exp(jnp.arange(0, d_model, 2, dtype=jnp.float32)
                       * (-(math.log(10000.0) / d_model)))                  # (d/2,)
    ang = position * div_term                                               # (L, d/2)
    pe = jnp.zeros((seq_len, d_model), jnp.float32)
    pe = pe.at[:, 0::2].set(jnp.sin(ang))
    pe = pe.at[:, 1::2].set(jnp.cos(ang))
    return pe.astype(dtype)


def _hw_budget():
    """(target output-tile bytes, VMEM-limit cap) derived from the chip's VMEM."""
    try:
        vmem_cap = int(getattr(pltpu.get_tpu_info(), "vmem_capacity_bytes",
                               128 << 20))
    except Exception:
        vmem_cap = 128 << 20
    if vmem_cap <= (64 << 20):       # v7x-class: 64 MiB/TC VMEM, 3.2 TB/s HBM
        return 4 << 20, 40 << 20
    return 8 << 20, 64 << 20         # v5e / v6e: 128 MiB VMEM


def _choose_seq_tile(seq_len, d_model, itemsize, target_bytes, sublane=8):
    """Largest multiple-of-`sublane` tile with ~target_bytes output rows."""
    tl = target_bytes // (d_model * itemsize)
    tl = max(sublane, (int(tl) // sublane) * sublane)
    seq_ceil = ((seq_len + sublane - 1) // sublane) * sublane
    return min(tl, seq_ceil)


def data_embedding(x, x_mark, conv_weight, time_weight, *,
                   pe_in_kernel=True, interpret=False):
    """Forward pass of DataEmbedding (dropout in eval mode).

    x:           (B, L, cIn)      float32
    x_mark:      (B, L, 3)        float32
    conv_weight: (dModel, cIn, 3) float32  (PyTorch Conv1d weight layout)
    time_weight: (dModel, 3)      float32  (PyTorch Linear weight layout)
    returns:     (B, L, dModel)   float32
    """
    batch, seq_len, c_in = x.shape
    d_model = conv_weight.shape[0]
    assert conv_weight.shape == (d_model, c_in, 3)
    assert time_weight.shape == (d_model, 3)
    assert x_mark.shape == (batch, seq_len, 3)
    assert d_model % 2 == 0

    # Circular conv (k=3, pad=1):
    #   y[l] = W[:,:,0] x[(l-1)%L] + W[:,:,1] x[l] + W[:,:,2] x[(l+1)%L]
    # Build shifted views once, fold the 3 conv taps AND the temporal Linear into
    # one (3*cIn + 3, dModel) weight -> the kernel body is a single contraction.
    x_prev = jnp.roll(x, 1, axis=1)
    x_next = jnp.roll(x, -1, axis=1)
    feats = jnp.concatenate([x_prev, x, x_next, x_mark], axis=-1)     # (B, L, K)
    k_dim = 3 * c_in + 3
    w_comb = jnp.concatenate(
        [conv_weight[:, :, 0].T, conv_weight[:, :, 1].T, conv_weight[:, :, 2].T,
         time_weight.T], axis=0)                                      # (K, dModel)

    itemsize = jnp.dtype(x.dtype).itemsize
    target_tile_bytes, vmem_cap = _hw_budget()
    tl = _choose_seq_tile(seq_len, d_model, itemsize, target_tile_bytes)

    # Pad L up to a tile multiple (lane/sublane-dense tiles, no masked tail stores).
    num_l_tiles = pl.cdiv(seq_len, tl)
    padded_len = num_l_tiles * tl
    if padded_len != seq_len:
        feats = jnp.pad(feats, ((0, 0), (0, padded_len - seq_len), (0, 0)))

    # Grid: L-tiles outermost ("parallel" -> sharded across v7x TensorCores, even
    # at batch=1), batch innermost ("arbitrary") so per-L-tile blocks keep their
    # block index across consecutive steps (no re-DMA of the PE table).
    grid = (num_l_tiles, batch)

    in_specs = [
        pl.BlockSpec((None, tl, k_dim), lambda l, b: (b, l, 0)),          # feats
        # Constant block index -> weight stays VMEM-resident across all steps.
        pl.BlockSpec((k_dim, d_model), lambda l, b: (0, 0)),              # folded W
    ]

    if pe_in_kernel:
        # Interleaved frequencies: freq[2i] = freq[2i+1] = exp(-2i*ln(1e4)/d).
        half = jnp.exp(jnp.arange(0, d_model, 2, dtype=jnp.float32)
                       * (-(math.log(10000.0) / d_model)))
        freq = jnp.repeat(half, 2).reshape(1, d_model)
        phase = jnp.tile(jnp.array([0.0, math.pi / 2.0], jnp.float32),
                         d_model // 2).reshape(1, d_model)
        extra_inputs = (freq, phase)
        in_specs += [pl.BlockSpec((1, d_model), lambda l, b: (0, 0)),
                     pl.BlockSpec((1, d_model), lambda l, b: (0, 0))]
        kernel = _kernel_pe_inline
        pe_bytes = 0
        transcendentals = batch * padded_len * d_model
    else:
        pe = _positional_embedding(padded_len, d_model)
        extra_inputs = (pe,)
        in_specs += [pl.BlockSpec((tl, d_model), lambda l, b: (l, 0))]
        kernel = _kernel_pe_table
        pe_bytes = 4 * padded_len * d_model
        transcendentals = 0

    out_spec = pl.BlockSpec((None, tl, d_model), lambda l, b: (b, l, 0))

    # VMEM budget: double-buffered streamed tiles + resident weight/freq/PE blocks.
    stream_bytes = 2 * itemsize * tl * (k_dim + d_model)
    if not pe_in_kernel:
        stream_bytes += 2 * 4 * tl * d_model
    resident_bytes = 4 * (k_dim + 2) * d_model
    vmem_limit = int(min(max(stream_bytes + resident_bytes + (2 << 20), 4 << 20),
                         vmem_cap))

    cost = pl.CostEstimate(
        flops=2 * batch * padded_len * k_dim * d_model,
        transcendentals=transcendentals,
        bytes_accessed=int(itemsize * batch * padded_len * (k_dim + d_model)
                           + 4 * k_dim * d_model + pe_bytes),
    )

    out = pl.pallas_call(
        kernel,
        out_shape=jax.ShapeDtypeStruct((batch, padded_len, d_model), x.dtype),
        grid_spec=pltpu.PrefetchScalarGridSpec(
            num_scalar_prefetch=0,
            grid=grid,
            in_specs=in_specs,
            out_specs=out_spec,
        ),
        compiler_params=pltpu.CompilerParams(
            dimension_semantics=("parallel", "arbitrary"),
            vmem_limit_bytes=vmem_limit,
        ),
        cost_estimate=cost,
        interpret=interpret,
    )(feats, w_comb, *extra_inputs)

    if padded_len != seq_len:
        out = out[:, :seq_len]

    # TODO(synk): nn.Dropout(p=0.1) is identity in eval mode; training-mode dropout
    # would use pltpu.prng_seed / pltpu.prng_random_bits inside the kernel.
    return out


if __name__ == "__main__":
    key = jax.random.PRNGKey(0)
    k_x, k_m, k_cw, k_tw = jax.random.split(key, 4)

    # dModel = 128 keeps the output last dim lane-dense (multiple of 128).
    batch, seq_len, c_in, d_model = 2, 16, 4, 128

    x = jax.random.normal(k_x, (batch, seq_len, c_in), dtype=jnp.float32)
    x_mark = jax.random.normal(k_m, (batch, seq_len, 3), dtype=jnp.float32)

    # Conv1d weight ~ kaiming_normal(fan_in, leaky_relu): N(0, gain^2 / fan_in).
    fan_in = c_in * 3
    gain = math.sqrt(2.0 / (1.0 + 0.01 ** 2))
    conv_weight = (gain / math.sqrt(fan_in)) * jax.random.normal(
        k_cw, (d_model, c_in, 3), dtype=jnp.float32)
    # Linear(3, dModel, bias=False) default init: U(-1/sqrt(3), 1/sqrt(3)).
    bound = 1.0 / math.sqrt(3.0)
    time_weight = jax.random.uniform(
        k_tw, (d_model, 3), minval=-bound, maxval=bound, dtype=jnp.float32)

    try:
        out = jax.block_until_ready(
            data_embedding(x, x_mark, conv_weight, time_weight, pe_in_kernel=True))
    except Exception:
        # Fallback for toolchains without an in-kernel sin lowering: stream a
        # precomputed PE table (still amortized to one read per L-tile by the
        # reordered grid).
        out = jax.block_until_ready(
            data_embedding(x, x_mark, conv_weight, time_weight, pe_in_kernel=False))

    # --- plain-JAX reference of the PyTorch forward (eval mode) -----------------
    hp = jax.lax.Precision.HIGHEST
    x_prev = jnp.roll(x, 1, axis=1)
    x_next = jnp.roll(x, -1, axis=1)
    ref_conv = (
        jnp.einsum("blc,dc->bld", x_prev, conv_weight[:, :, 0], precision=hp)
        + jnp.einsum("blc,dc->bld", x, conv_weight[:, :, 1], precision=hp)
        + jnp.einsum("blc,dc->bld", x_next, conv_weight[:, :, 2], precision=hp)
    )
    ref_time = jnp.einsum("blf,df->bld", x_mark, time_weight, precision=hp)
    ref = ref_conv + ref_time + _positional_embedding(seq_len, d_model)[None]

    assert out.shape == (batch, seq_len, d_model)
    assert jnp.allclose(out, ref, atol=1e-3, rtol=1e-3), (
        "max abs err = %e" % float(jnp.max(jnp.abs(out - ref))))

    print("KERNEL_OK")
</pallas_src>

<mosaic_0001>
module attributes {stable_mosaic.version = 11 : i64} {
  func.func @_kernel_pe_inline(%arg0: i32, %arg1: i32, %arg2: memref<1x16x15xf32, #tpu.memory_space<vmem>>, %arg3: memref<15x128xf32, #tpu.memory_space<vmem>>, %arg4: memref<1x128xf32, #tpu.memory_space<vmem>>, %arg5: memref<1x128xf32, #tpu.memory_space<vmem>>, %arg6: memref<1x16x128xf32, #tpu.memory_space<vmem>>) attributes {dimension_semantics = [#tpu.dimension_semantics<parallel>, #tpu.dimension_semantics<arbitrary>], iteration_bounds = array<i64: 1, 2>, scalar_prefetch = 0 : i64, scratch_operands = 0 : i64, tpu.core_type = #tpu.core_type<tc>, window_params = [{transform_indices = @transform_0, window_bounds = array<i64: 1, 16, 15>}, {pipeline_mode = #tpu.pipeline_mode<synchronous>, transform_indices = @transform_1, window_bounds = array<i64: 15, 128>}, {pipeline_mode = #tpu.pipeline_mode<synchronous>, transform_indices = @transform_2, window_bounds = array<i64: 1, 128>}, {pipeline_mode = #tpu.pipeline_mode<synchronous>, transform_indices = @transform_3, window_bounds = array<i64: 1, 128>}, {transform_indices = @transform_4, window_bounds = array<i64: 1, 16, 128>}]} {
    %0 = tpu.iota {dimensions = array<i32: 0>} : vector<16x128xi32>
    %1 = arith.sitofp %0 : vector<16x128xi32> to vector<16x128xf32>
    %c16_i32 = arith.constant 16 : i32
    %2 = arith.muli %arg0, %c16_i32 : i32
    %3 = arith.sitofp %2 : i32 to f32
    %4 = vector.broadcast %3 : f32 to vector<16x128xf32>
    %5 = arith.addf %1, %4 : vector<16x128xf32>
    %c0 = arith.constant 0 : index
    %c0_0 = arith.constant 0 : index
    %6 = vector.load %arg4[%c0, %c0_0] : memref<1x128xf32, #tpu.memory_space<vmem>>, vector<1x128xf32>
    %7 = vector.broadcast %6 : vector<1x128xf32> to vector<16x128xf32>
    %8 = arith.mulf %5, %7 : vector<16x128xf32>
    %c0_1 = arith.constant 0 : index
    %c0_2 = arith.constant 0 : index
    %9 = vector.load %arg5[%c0_1, %c0_2] : memref<1x128xf32, #tpu.memory_space<vmem>>, vector<1x128xf32>
    %10 = vector.broadcast %9 : vector<1x128xf32> to vector<16x128xf32>
    %11 = arith.addf %8, %10 : vector<16x128xf32>
    %12 = math.sin %11 : vector<16x128xf32>
    %c0_3 = arith.constant 0 : index
    %c0_4 = arith.constant 0 : index
    %c0_5 = arith.constant 0 : index
    %13 = vector.load %arg2[%c0_3, %c0_4, %c0_5] : memref<1x16x15xf32, #tpu.memory_space<vmem>>, vector<1x16x15xf32>
    %14 = vector.shape_cast %13 : vector<1x16x15xf32> to vector<16x15xf32>
    %c0_6 = arith.constant 0 : index
    %c0_7 = arith.constant 0 : index
    %15 = vector.load %arg3[%c0_6, %c0_7] : memref<15x128xf32, #tpu.memory_space<vmem>>, vector<15x128xf32>
    %cst = arith.constant dense<0.000000e+00> : vector<16x128xf32>
    %16 = tpu.matmul %14, %15, %cst {dimension_numbers = #tpu.dot_dimension_numbers<[1], [0], [0], [1], [0, 0, 1, 1], [], []>} : vector<16x15xf32>, vector<15x128xf32>, vector<16x128xf32> -> vector<16x128xf32>
    %17 = arith.addf %12, %16 : vector<16x128xf32>
    %c0_8 = arith.constant 0 : index
    %c0_9 = arith.constant 0 : index
    %c0_10 = arith.constant 0 : index
    %18 = vector.load %arg6[%c0_8, %c0_9, %c0_10] : memref<1x16x128xf32, #tpu.memory_space<vmem>>, vector<1x16x128xf32>
    %19 = vector.shape_cast %18 : vector<1x16x128xf32> to vector<16x128xf32>
    %20 = vector.shape_cast %17 : vector<16x128xf32> to vector<1x16x128xf32>
    tpu.vector_store %arg6[%c0_8, %c0_9, %c0_10], %20 {strides = array<i32>} : memref<1x16x128xf32, #tpu.memory_space<vmem>>, vector<1x16x128xf32>,
    return
  }
  func.func @transform_0(%arg0: i32, %arg1: i32) -> (i32, i32, i32) {
    %c0_i32 = arith.constant 0 : i32
    %c0_i32_0 = arith.constant 0 : i32
    return %arg1, %arg0, %c0_i32 : i32, i32, i32
  }
  func.func @transform_1(%arg0: i32, %arg1: i32) -> (i32, i32) {
    %c0_i32 = arith.constant 0 : i32
    %c0_i32_0 = arith.constant 0 : i32
    %c0_i32_1 = arith.constant 0 : i32
    return %c0_i32, %c0_i32_0 : i32, i32
  }
  func.func @transform_2(%arg0: i32, %arg1: i32) -> (i32, i32) {
    %c0_i32 = arith.constant 0 : i32
    %c0_i32_0 = arith.constant 0 : i32
    %c0_i32_1 = arith.constant 0 : i32
    return %c0_i32, %c0_i32_0 : i32, i32
  }
  func.func @transform_3(%arg0: i32, %arg1: i32) -> (i32, i32) {
    %c0_i32 = arith.constant 0 : i32
    %c0_i32_0 = arith.constant 0 : i32
    %c0_i32_1 = arith.constant 0 : i32
    return %c0_i32, %c0_i32_0 : i32, i32
  }
  func.func @transform_4(%arg0: i32, %arg1: i32) -> (i32, i32, i32) {
    %c0_i32 = arith.constant 0 : i32
    %c0_i32_0 = arith.constant 0 : i32
    return %arg1, %arg0, %c0_i32 : i32, i32, i32
  }
}

module attributes {stable_mosaic.version = 11 : i64} {
  func.func @_kernel_pe_table(%arg0: i32, %arg1: i32, %arg2: memref<1x16x15xf32, #tpu.memory_space<vmem>>, %arg3: memref<15x128xf32, #tpu.memory_space<vmem>>, %arg4: memref<16x128xf32, #tpu.memory_space<vmem>>, %arg5: memref<1x16x128xf32, #tpu.memory_space<vmem>>) attributes {dimension_semantics = [#tpu.dimension_semantics<parallel>, #tpu.dimension_semantics<arbitrary>], iteration_bounds = array<i64: 1, 2>, scalar_prefetch = 0 : i64, scratch_operands = 0 : i64, tpu.core_type = #tpu.core_type<tc>, window_params = [{transform_indices = @transform_0, window_bounds = array<i64: 1, 16, 15>}, {pipeline_mode = #tpu.pipeline_mode<synchronous>, transform_indices = @transform_1, window_bounds = array<i64: 15, 128>}, {transform_indices = @transform_2, window_bounds = array<i64: 16, 128>}, {transform_indices = @transform_3, window_bounds = array<i64: 1, 16, 128>}]} {
    %c0 = arith.constant 0 : index
    %c0_0 = arith.constant 0 : index
    %0 = vector.load %arg4[%c0, %c0_0] : memref<16x128xf32, #tpu.memory_space<vmem>>, vector<16x128xf32>
    %c0_1 = arith.constant 0 : index
    %c0_2 = arith.constant 0 : index
    %c0_3 = arith.constant 0 : index
    %1 = vector.load %arg2[%c0_1, %c0_2, %c0_3] : memref<1x16x15xf32, #tpu.memory_space<vmem>>, vector<1x16x15xf32>
    %2 = vector.shape_cast %1 : vector<1x16x15xf32> to vector<16x15xf32>
    %c0_4 = arith.constant 0 : index
    %c0_5 = arith.constant 0 : index
    %3 = vector.load %arg3[%c0_4, %c0_5] : memref<15x128xf32, #tpu.memory_space<vmem>>, vector<15x128xf32>
    %cst = arith.constant dense<0.000000e+00> : vector<16x128xf32>
    %4 = tpu.matmul %2, %3, %cst {dimension_numbers = #tpu.dot_dimension_numbers<[1], [0], [0], [1], [0, 0, 1, 1], [], []>} : vector<16x15xf32>, vector<15x128xf32>, vector<16x128xf32> -> vector<16x128xf32>
    %5 = arith.addf %0, %4 : vector<16x128xf32>
    %c0_6 = arith.constant 0 : index
    %c0_7 = arith.constant 0 : index
    %c0_8 = arith.constant 0 : index
    %6 = vector.load %arg5[%c0_6, %c0_7, %c0_8] : memref<1x16x128xf32, #tpu.memory_space<vmem>>, vector<1x16x128xf32>
    %7 = vector.shape_cast %6 : vector<1x16x128xf32> to vector<16x128xf32>
    %8 = vector.shape_cast %5 : vector<16x128xf32> to vector<1x16x128xf32>
    tpu.vector_store %arg5[%c0_6, %c0_7, %c0_8], %8 {strides = array<i32>} : memref<1x16x128xf32, #tpu.memory_space<vmem>>, vector<1x16x128xf32>,
    return
  }
  func.func @transform_0(%arg0: i32, %arg1: i32) -> (i32, i32, i32) {
    %c0_i32 = arith.constant 0 : i32
    %c0_i32_0 = arith.constant 0 : i32
    return %arg1, %arg0, %c0_i32 : i32, i32, i32
  }
  func.func @transform_1(%arg0: i32, %arg1: i32) -> (i32, i32) {
    %c0_i32 = arith.constant 0 : i32
    %c0_i32_0 = arith.constant 0 : i32
    %c0_i32_1 = arith.constant 0 : i32
    return %c0_i32, %c0_i32_0 : i32, i32
  }
  func.func @transform_2(%arg0: i32, %arg1: i32) -> (i32, i32) {
    %c0_i32 = arith.constant 0 : i32
    %c0_i32_0 = arith.constant 0 : i32
    return %arg0, %c0_i32 : i32, i32
  }
  func.func @transform_3(%arg0: i32, %arg1: i32) -> (i32, i32, i32) {
    %c0_i32 = arith.constant 0 : i32
    %c0_i32_0 = arith.constant 0 : i32
    return %arg1, %arg0, %c0_i32 : i32, i32, i32
  }
}

</mosaic_0001>

<bundles_post_ra>
// kernel: tpu_custom_call.1
= control target key start
LH: loop header
LB: loop body
LE: loop exit
PB: predicated region body
PF: predicated region fallthrough
CT: control target
= control target key end

     0   :  { %9 = vsyncpa [#allocation3], 0  ;;  %s1138_s0 = inlined_call_operand.vmem [shape: f32[2,16,15], index: 0, kind: input, shape index: {}]   ;;  %s1139_s1 = inlined_call_operand.vmem [shape: f32[15,128], index: 1, kind: input, shape index: {}]   ;;  %s1140_s2 = inlined_call_operand.vmem [shape: f32[1,128], index: 2, kind: input, shape index: {}]   ;;  %s1141_s3 = inlined_call_operand.vmem [shape: f32[1,128], index: 3, kind: input, shape index: {}]   ;;  %s1142_s4 = inlined_call_operand.hbm [shape: f32[2,16,128], index: 4, kind: output, shape index: {}]  }
   0x1   :  { %11 = vsyncpa [#allocation3 + $0x1], 0  ;;  %s882_s15 = smov 0   ;;  %s884_s16 = smov 0  }
   0x2   :  { %s886_s17 = smov 0   ;;  %s888_s18 = smov 0  }
   0x3   :  { %s890_s19 = smov 0   ;;  %s892_s20 = smov 0  }
   0x4 LB: > { %s652_s21 = sadd.s32 4294967295, %s846_s20   ;;  %s653_s22 = sadd.s32 4294967294, %s846_s20   ;;  %s846_s20 = sphi %s892_s20, %s17_s20   ;;  %s842_s19 = sphi %s890_s19, %s1151_s19   ;;  %s838_s18 = sphi %s888_s18, %s1150_s18   ;;  %s834_s17 = sphi %s886_s17, %s1149_s17   ;;  %s830_s16 = sphi %s884_s16, %s1148_s16   ;;  %s826_s15 = sphi %s882_s15, %s1147_s15  }
   0x5   : > { %s26_s23 = sadd.s32 1, %s842_s19  ;;  %s129_s24 = sadd.s32 1, %s834_s17 }
   0x6   : > { %p27_p0 = scmp.ge.s32.totalorder %s26_s23, 2  ;;  %p139_p1 = scmp.ne.s32.totalorder %s834_s17, %s830_s16 }
   0x7   : > { %p140_p2 = scmp.eq.s32.totalorder %s652_s21, 1  ;;  %p145_p3 = scmp.ne.s32.totalorder %s830_s16, %s826_s15 }
   0x8   : > { %s1153_s23 = smov (%p27_p0, %s26_s23), 0  ;;  %p146_p5 = scmp.eq.s32.totalorder %s653_s22, 1 }
   0x9   : > { %p922_p4 = por %p140_p2, %p139_p1  ;;  %s124_s26 = ssub.s32 %s842_s19, %s1153_s23 }
   0xa   : > { %p656_p6 = scmp.ge.s32.totalorder %s846_s20, 1  ;;  %p127_p7 = scmp.eq.s32.totalorder %s124_s26, 0 }
   0xb   : > { %p929_p8 = por %p146_p5, %p145_p3  ;;  %p186_p9 = scmp.lt.s32.totalorder %s846_s20, 3 }
   0xc   : > { %s935_s28 = scalar_select %p127_p7, %s834_s17, %s129_s24  }
   0xd   : > { %p187_p10 = pnand %p656_p6, %p186_p9 }
   0xe   : > { %p217_p11 = scmp.lt.s32.totalorder (!%p187_p10), %s838_s18, 1  ;;  %s213_s22 = sand.u32 (!%p187_p10), 1, %s830_s16  }
   0xf   : > { %190 = sbr.rel (%p187_p10) target bundleno = 237 (0xed), region = 36  ;;  %s657_s24 = sshll.u32 (!%p187_p10), %s213_s22, 4 }
  0x10   : > { %s215_s26 = scalar_lea.vmem (!%p187_p10), [#allocation2], %s657_s24  ;;  %s679_s30 = sshll.u32 (!%p187_p10), %s838_s18, 8 }
  0x11   : > { %s573_s29 = sshll.u32 (!%p187_p10), %s215_s26, 4  ;;  %s854_s9 = smov (!%p187_p10), [#allocation2]   ;;  %s1086_s29 = int_to_ptr.vmem [resolvable:$true] %s573_s29 }
  0x12   : > { %s774_s10 = sshll.u32 (!%p187_p10), %s854_s9, 4  ;;  %s775_s10 = int_to_ptr.vmem [resolvable:$false] %s774_s10 }
  0x13   : > { %p777_p1 = scmp.lt.s32.totalorder (!%p187_p10), %s1086_s29, %s775_s10 }
  0x14   : > { %v466_v0 = vld [vmem:[%s1139_s1 + $0x8] sm:$0x7f]  ;;  %vm474_vm0 = vcmask 1046528   ;;  %v465_v1 = vld [vmem:[%s1139_s1] sm:$0xff]  ;;  %s218_s7 = scalar_select %p217_p11, %s838_s18, 1  ;;  %vm467_vm1 = vcmask 121856   ;;  %v227_v4 = vlaneseq }
  0x15   : > { %684 = vmatprep.subr.msk.mxu0 %vm474_vm0, %v466_v0  ;;  %v660_v8 = vld [vmem:[%s1140_s2] ss:$0 sm:$0xff]  ;;  %v848_v34 = vmov 2102212464   ;;  %v849_v36 = vmov 920167782  }
  0x16   : > { %685 = vmatpush3.msk.msra.mxu0 %vm474_vm0, %v466_v0  ;;  %s678_s8 = sshll.u32 %s218_s7, 4  ;;  %v228_v5 = vshrl.u32 %v227_v4, 7  ;;  %v661_v11 = vld [vmem:[%s1141_s3] ss:$0 sm:$0xff]  ;;  %v850_v38 = vmov 683565275   ;;  %s1091_s7 = scalar_lea.hbm %s1142_s4, %s679_s30 }
  0x17   : > { %686 = vmatprep.subr.mxu0 %v465_v1  ;;  %s224_s11 = scalar_lea.vmem %s1138_s0, %s678_s8  ;;  %v851_v41 = vmov 2475754826   ;;  %v852_v44 = vmov 1326507024   ;;  %v853_v47 = vmov 2131351028  }
  0x18   : > { %687 = vmatpush3.msra.mxu0 %v465_v1  ;;  %v463_v2 = vld [vmem:[%s224_s11] sm:$0xff]  ;;  %v464_v3 = vld [vmem:[%s224_s11 + $0x8] sm:$0xff]  ;;  %v229_v6 = vadd.s32 8, %v228_v5  ;;  %v230_v9 = vcvt.s32.f32 %v228_v5  ;;  %s1093_s8 = scalar_lea.sflag [#allocation3], %s213_s22  ;;  %s770_s18 = scalar_lea.vmem %s1086_s29, 256 }
  0x19   : > { %688 = vmatprep.mubr.msk.f32.mxu0 %vm467_vm1, %v463_v2  ;;  %p771_p12 = scmp.ne.s32.totalorder %s1086_s29, %s770_s18  ;;  %s776_s11 = scalar_lea.vmem %s775_s10, 512 }
  0x1a   : > { %689 = vmatmul.mubr.msk.f32.vlgmr.msra.gmra.mxu0 %vm467_vm1, %v464_v3  ;;  %v231_v7 = vcvt.s32.f32 %v229_v6  ;;  %v244_v12 = vmul.f32 %v660_v8, %v230_v9  ;;  %p778_p2 = scmp.lt.s32.totalorder %s776_s11, %s770_s18 }
  0x1b   : > { %p772_p13 = pnand %p771_p12, %p922_p4 }
  0x1c   : > { %v245_v10 = vmul.f32 %v660_v8, %v231_v7  ;;  %v956_v14 = vadd.f32 %v661_v11, %v244_v12  ;;  %p779_p3 = por %p778_p2, %p777_p1 }
  0x1d   : > { %p773_p0 = pneg %p772_p13 }
  0x1e   : > { %v954_v13 = vadd.f32 %v661_v11, %v245_v10  ;;  %v258_v16 = vand.u32 2139095040, %v956_v14  ;;  %v255_v31 = vand.u32 2147483647, %v956_v14  ;;  %vm257_vm1 = vcmp.lt.s32.totalorder %v956_v14, 0 }
  0x1f   : > { %p780_p5 = pnand %p779_p3, %p773_p0 }
  0x20   : > { %v362_v15 = vand.u32 2139095040, %v954_v13  ;;  %v259_v18 = vshrl.u32 %v258_v16, 23  ;;  %v359_v27 = vand.u32 2147483647, %v954_v13  ;;  %v262_v63 = vand.u32 8388607, %v255_v31 }
  0x21   : > { %vm361_vm0 = vcmp.lt.s32.totalorder %v954_v13, 0 }
  0x22   : > { %v363_v17 = vshrl.u32 %v362_v15, 23  ;;  %v662_v20 = vadd.s32 4294967169, %v259_v18  ;;  %v366_v30 = vand.u32 8388607, %v359_v27  ;;  %v263_v10 = vor.u32 8388608, %v262_v63 }
  0x24   : > { %v666_v19 = vadd.s32 4294967169, %v363_v17  ;;  %v265_v22 = vadd.s32 1, %v662_v20  ;;  %v367_v4 = vor.u32 8388608, %v366_v30 }
  0x26   : > { %v369_v21 = vadd.s32 1, %v666_v19  ;;  %vm266_vm3 = vcmp.gt.s32.totalorder %v265_v22, 0  ;;  %v407_v19 = vshll.u32 %v367_v4, 8 }
  0x27   : > { %v267_v24 = vsel %vm266_vm3, %v265_v22, 0  ;;  %vm256_vm3 = vcmp.le.f32.partialorder %v255_v31, 0.7853982 }
  0x28   : > { %vm370_vm2 = vcmp.gt.s32.totalorder %v369_v21, 0  ;;  %v269_v26 = vand.u32 31, %v267_v24  ;;  %v968_v32 = vshrl.u32 %v267_v24, 5 }
  0x29   : > { %v371_v23 = vsel %vm370_vm2, %v369_v21, 0  ;;  %vm1070_vm2 = vcmp.le.f32.partialorder %v359_v27, 0.7853982 }
  0x2a   : > { %v373_v25 = vand.u32 31, %v371_v23  ;;  %v963_v29 = vsub.s32 32, %v269_v26  ;;  %v970_v33 = vshrl.u32 %v371_v23, 5  ;;  %v272_v39 = vshll.u32 %v850_v38, %v269_v26 }
  0x2b   : > { %v281_v49 = vshll.u32 %v848_v34, %v269_v26  ;;  %v284_v53 = vshll.u32 %v849_v36, %v269_v26  ;;  %v275_v56 = vshll.u32 %v851_v41, %v269_v26  ;;  %v278_v57 = vshll.u32 %v853_v47, %v269_v26 }
  0x2c   : > { %v961_v28 = vsub.s32 32, %v373_v25  ;;  %v385_v35 = vshll.u32 %v848_v34, %v373_v25  ;;  %v376_v40 = vshll.u32 %v850_v38, %v373_v25  ;;  %v379_v42 = vshll.u32 %v851_v41, %v373_v25 }
  0x2d   : > { %v388_v43 = vshll.u32 %v849_v36, %v373_v25  ;;  %v382_v48 = vshll.u32 %v853_v47, %v373_v25  ;;  %v282_v50 = vshrl.u32 %v849_v36, %v963_v29  ;;  %v285_v54 = vshrl.u32 %v852_v44, %v963_v29 }
  0x2e   : > { %v386_v37 = vshrl.u32 %v849_v36, %v961_v28  ;;  %v389_v45 = vshrl.u32 %v852_v44, %v961_v28  ;;  %v377_v46 = vshrl.u32 %v851_v41, %v961_v28  ;;  %v380_v51 = vshrl.u32 %v853_v47, %v961_v28 }
  0x2f   : > { %v383_v52 = vshrl.u32 %v848_v34, %v961_v28  ;;  %vm394_vm4 = vcmp.lt.s32.totalorder %v970_v33, 4  ;;  %v273_v59 = vshrl.u32 %v851_v41, %v963_v29  ;;  %v276_v60 = vshrl.u32 %v853_v47, %v963_v29 }
  0x30   : > { %v387_v55 = vor.u32 %v386_v37, %v385_v35  ;;  %v390_v58 = vor.u32 %v389_v45, %v388_v43  ;;  %v279_v61 = vshrl.u32 %v848_v34, %v963_v29  ;;  %v378_v62 = vor.u32 %v377_v46, %v376_v40 }
  0x31   : > { %v283_v0 = vor.u32 %v282_v50, %v281_v49  ;;  %v381_v1 = vor.u32 %v380_v51, %v379_v42  ;;  %v384_v2 = vor.u32 %v383_v52, %v382_v48  ;;  %v286_v3 = vor.u32 %v285_v54, %v284_v53 }
  0x32   : > { %vm290_vm5 = vcmp.lt.s32.totalorder %v968_v32, 4  ;;  %vm391_vm6 = vcmp.lt.s32.totalorder %v970_v33, 1  ;;  %vm393_vm7 = vcmp.lt.s32.totalorder %v970_v33, 3  ;;  %v400_v5 = vsel %vm394_vm4, %v387_v55, 920167782 }
  0x33   : > { %v404_v6 = vsel %vm394_vm4, %v390_v58, 1326507024  ;;  %v274_v7 = vor.u32 %v273_v59, %v272_v39  ;;  %v277_v8 = vor.u32 %v276_v60, %v275_v56  ;;  %v280_v9 = vor.u32 %v279_v61, %v278_v57 }
  0x34   : > { %vm287_vm8 = vcmp.lt.s32.totalorder %v968_v32, 1  ;;  %vm289_vm9 = vcmp.lt.s32.totalorder %v968_v32, 3  ;;  %v296_v11 = vsel %vm290_vm5, %v283_v0, 920167782  ;;  %vm392_vm10 = vcmp.lt.s32.totalorder %v970_v33, 2 }
  0x35   : > { %v399_v12 = vsel %vm391_vm6, %v378_v62, %v381_v1  ;;  %v401_v15 = vsel %vm393_vm7, %v384_v2, %v400_v5  ;;  %v300_v16 = vsel %vm290_vm5, %v286_v3, 1326507024  ;;  %v403_v17 = vsel %vm391_vm6, %v381_v1, %v384_v2 }
  0x36   : > { %v405_v18 = vsel %vm393_vm7, %v387_v55, %v404_v6  ;;  %vm288_vm11 = vcmp.lt.s32.totalorder %v968_v32, 2  ;;  %v295_v20 = vsel %vm287_vm8, %v274_v7, %v277_v8  ;;  %v297_v21 = vsel %vm289_vm9, %v280_v9, %v296_v11 }
  0x37   : > { %v402_v22 = vsel %vm392_vm10, %v399_v12, %v401_v15  ;;  %v299_v23 = vsel %vm287_vm8, %v277_v8, %v280_v9  ;;  %v301_v24 = vsel %vm289_vm9, %v283_v0, %v300_v16  ;;  %v406_v25 = vsel %vm392_vm10, %v403_v17, %v405_v18 }
  0x38   : > { %v303_v26 = vshll.u32 %v263_v10, 8  ;;  %v298_v30 = vsel %vm288_vm11, %v295_v20, %v297_v21  ;;  %v1024_v34 = vmul.u32.u64.low %v407_v19, %v402_v22  ;;  %v1025_v35 = vmul.u32.u64.high %v407_v19, %v402_v22, %v1024_v34 }
  0x39   : > { %v302_v36 = vsel %vm288_vm11, %v299_v23, %v301_v24  ;;  %v375_v37 = vshrl.u32 %v850_v38, %v961_v28  ;;  %v1031_v39 = vmul.u32.u64.low %v407_v19, %v406_v25  ;;  %v1032_v40 = vmul.u32.u64.high %v407_v19, %v406_v25, %v1031_v39 }
  0x3a   : > { %v396_v41 = vsel %vm394_vm4, %v384_v2, 2102212464  ;;  %v1036_v42 = vmul.u32.u64.low %v303_v26, %v298_v30  ;;  %v1037_v43 = vmul.u32.u64.high %v303_v26, %v298_v30, %v1036_v42  ;;  %v271_v44 = vshrl.u32 %v850_v38, %v963_v29 }
  0x3b   : > { %v1041_v45 = vmul.u32.u64.low %v303_v26, %v302_v36  ;;  %v1042_v46 = vmul.u32.u64.high %v303_v26, %v302_v36, %v1041_v45  ;;  %v292_v47 = vsel %vm290_vm5, %v280_v9, 2102212464  ;;  %v395_v28 = vsel %vm391_vm6, %v375_v37, %v378_v62 }
  0x3c   : > { %v397_v48 = vsel %vm393_vm7, %v381_v1, %v396_v41  ;;  %v291_v49 = vsel %vm287_vm8, %v271_v44, %v274_v7  ;;  %v293_v50 = vsel %vm289_vm9, %v277_v8, %v292_v47  ;;  %v417_v38 = vadd.s32 1, %v1025_v35 }
  0x3d   : > { %v398_v29 = vsel %vm392_vm10, %v395_v28, %v397_v48  ;;  %vm416_vm12 = vc.u32 %v1032_v40, %v1024_v34  ;;  %v294_v51 = vsel %vm288_vm11, %v291_v49, %v293_v50  ;;  %v313_v52 = vadd.s32 1, %v1037_v43 }
  0x3e   : > { %v414_v53 = vmul.u32 %v407_v19, %v398_v29  ;;  %vm312_vm13 = vc.u32 %v1042_v46, %v1036_v42  ;;  %v418_v54 = vsel %vm416_vm12, %v417_v38, %v1025_v35  ;;  %v310_v55 = vmul.u32 %v303_v26, %v294_v51 }
  0x3f   : > { %v314_v56 = vsel %vm312_vm13, %v313_v52, %v1037_v43  ;;  %v415_v15 = vadd.s32 %v1024_v34, %v1032_v40  ;;  %v311_v18 = vadd.s32 %v1036_v42, %v1042_v46  ;;  %vm451_vm10 = vweird.f32 %v954_v13 }
  0x40   : > { %v419_v57 = vadd.s32 %v418_v54, %v414_v53  ;;  %v315_v33 = vadd.s32 %v314_v56, %v310_v55  ;;  %vm347_vm11 = vweird.f32 %v956_v14 }
  0x42   : > { %v420_v58 = vadd.s32 536870912, %v419_v57  ;;  %v316_v59 = vadd.s32 536870912, %v315_v33 }
  0x44   : > { %v421_v60 = vshrl.u32 %v420_v58, 30  ;;  %v317_v61 = vshrl.u32 %v316_v59, 30 }
  0x46   : > { %v422_v62 = vshll.u32 %v421_v60, 30  ;;  %v318_v63 = vshll.u32 %v317_v61, 30  ;;  %v445_v50 = vsub.s32 4, %v421_v60  ;;  %v341_v29 = vsub.s32 4, %v317_v61 }
  0x48   : > { %v423_v32 = vsub.s32 %v419_v57, %v422_v62  ;;  %v319_v0 = vsub.s32 %v315_v33, %v318_v63  ;;  %v446_v27 = vsel %vm361_vm0, %v445_v50, %v421_v60  ;;  %v342_v38 = vsel %vm257_vm1, %v341_v29, %v317_v61 }
  0x49   : > { %v448_v51 = vsel %vm1070_vm2, 0, %v446_v27  ;;  %v344_v31 = vsel %vm256_vm3, 0, %v342_v38 }
  0x4a   : > { %v425_v1 = vsub.s32 0, %v423_v32  ;;  %v321_v2 = vsub.s32 0, %v319_v0  ;;  %v452_v52 = vadd.s32 3, %v448_v51  ;;  %v348_v53 = vadd.s32 3, %v344_v31 }
  0x4c   : > { %v667_v3 = vmin.u32 %v425_v1, %v423_v32  ;;  %v663_v4 = vmin.u32 %v321_v2, %v319_v0  ;;  %v453_v56 = vand.u32 3, %v452_v52  ;;  %v349_v58 = vand.u32 3, %v348_v53 }
  0x4e   : > { %v427_v5 = vclz %v667_v3  ;;  %v323_v6 = vclz %v663_v4  ;;  %vm455_vm4 = vcmp.eq.s32.totalorder %v453_v56, 0  ;;  %vm458_vm5 = vcmp.eq.s32.totalorder %v453_v56, 2 }
  0x4f   : > { %vm351_vm6 = vcmp.eq.s32.totalorder %v349_v58, 0  ;;  %vm354_vm7 = vcmp.eq.s32.totalorder %v349_v58, 2  ;;  %vm454_vm8 = vcmp.lt.s32.totalorder %v453_v56, 2  ;;  %vm350_vm9 = vcmp.lt.s32.totalorder %v349_v58, 2 }
  0x50   : > { %v668_v7 = vadd.s32 4294967294, %v427_v5  ;;  %v664_v8 = vadd.s32 4294967294, %v323_v6 }
  0x52   : > { %vm669_vm14 = vcmp.lt.s32.totalorder %v668_v7, 0  ;;  %vm665_vm15 = vcmp.lt.s32.totalorder %v664_v8, 0 }
  0x53   : > { %v430_v9 = vsel %vm669_vm14, 0, %v668_v7  ;;  %v326_v10 = vsel %vm665_vm15, 0, %v664_v8 }
  0x54   : > { %v435_v11 = vsub.s32 4294967266, %v430_v9  ;;  %v331_v12 = vsub.s32 4294967266, %v326_v10  ;;  %v431_v16 = vsub.s32 32, %v430_v9  ;;  %v327_v19 = vsub.s32 32, %v326_v10 }
  0x55   : > { %v432_v21 = vshll.u32 %v423_v32, %v430_v9  ;;  %v328_v24 = vshll.u32 %v319_v0, %v326_v10 }
  0x56   : > { %v436_v17 = vadd.s32 127, %v435_v11  ;;  %v332_v20 = vadd.s32 127, %v331_v12  ;;  %v433_v22 = vshrl.u32 %v415_v15, %v431_v16  ;;  %v329_v25 = vshrl.u32 %v311_v18, %v327_v19 }
  0x58   : > { %v437_v23 = vshll.u32 %v436_v17, 23  ;;  %v333_v26 = vshll.u32 %v332_v20, 23  ;;  %v434_v30 = vor.u32 %v433_v22, %v432_v21  ;;  %v330_v36 = vor.u32 %v329_v25, %v328_v24 }
  0x5a   : > { %v438_v35 = vor.u32 4788187, %v437_v23  ;;  %v334_v37 = vor.u32 4788187, %v333_v26  ;;  %v441_v41 = vcvt.s32.f32 %v434_v30  ;;  %v337_v34 = vcvt.s32.f32 %v330_v36 }
  0x5c   : > { %v439_v39 = vand.u32 2147483647, %v438_v35  ;;  %v335_v43 = vand.u32 2147483647, %v334_v37 }
  0x5e   : > { %v442_v40 = vmul.f32 %v441_v41, %v439_v39  ;;  %v338_v44 = vmul.f32 %v337_v34, %v335_v43 }
  0x60   : > { %v443_v45 = vxor.u32 2147483648, %v442_v40  ;;  %v339_v42 = vxor.u32 2147483648, %v338_v44 }
  0x62   : > { %v444_v47 = vsel %vm361_vm0, %v443_v45, %v442_v40  ;;  %v340_v28 = vsel %vm257_vm1, %v339_v42, %v338_v44 }
  0x63   : > { %v447_v48 = vsel %vm1070_vm2, %v954_v13, %v444_v47  ;;  %v343_v49 = vsel %vm256_vm3, %v956_v14, %v340_v28 }
  0x64   : > { %762 = vcosq.f32 %v447_v48 }
  0x65   : > { %764 = vsinq.f32 %v447_v48 }
  0x66   : > { %766 = vcosq.f32 %v343_v49 }
  0x67   : > { %768 = vsinq.f32 %v343_v49 }
  0x71   : > { %v763_v54 = vpop.eup %762 }
  0x72   : > { %v765_v55 = vpop.eup %764  ;;  %v459_v62 = vxor.u32 2147483648, %v763_v54 }
  0x73   : > { %v767_v57 = vpop.eup %766  ;;  %v456_v59 = vxor.u32 2147483648, %v765_v55 }
  0x74   : > { %v769_v33 = vpop.eup %768  ;;  %v355_v63 = vxor.u32 2147483648, %v767_v57  ;;  %v460_v32 = vsel %vm458_vm5, %v459_v62, %v765_v55 }
  0x75   : > { %v352_v60 = vxor.u32 2147483648, %v769_v33  ;;  %v457_v61 = vsel %vm455_vm4, %v763_v54, %v456_v59 }
  0x76   : > { %v356_v1 = vsel %vm354_vm7, %v355_v63, %v769_v33  ;;  %v461_v2 = vsel %vm454_vm8, %v457_v61, %v460_v32 }
  0x77   : > { %v353_v0 = vsel %vm351_vm6, %v767_v57, %v352_v60  ;;  %v462_v4 = vsel %vm451_vm10, nan, %v461_v2 }
  0x78   : > { %v357_v3 = vsel %vm350_vm9, %v353_v0, %v356_v1 }
  0x79   : > { %v358_v6 = vsel %vm347_vm11, nan, %v357_v3 }
  0xda   : > { %v690_v5 = vpop.f32.mrf.mxu0 }
  0xdb   : > { %v554_v7 = vadd.f32 %v690_v5, %v462_v4 }
  0xdc   : > { %v544_v8 = vpop.f32.mrf.mxu0 }
  0xdd   : > { %556 = vst [vmem:[%s215_s26 + $0x8] sm:$0xff] %v554_v7  ;;  %v553_v13 = vadd.f32 %v544_v8, %v358_v6 }
  0xdf   : > { %555 = vst [vmem:[%s215_s26] sm:$0xff] %v553_v13 }
  0xe0   : > { %783 = shalt.err (!%p780_p5)
}
  0xe1   : > { %s784_s12 = scalar_lea.hbm %s1091_s7, 256  ;;  %s788_s21 = scalar_lea.hbm %s1142_s4, 512 }
  0xe2   : > { %p785_p6 = scmp.ne.s32.totalorder %s1091_s7, %s784_s12  ;;  %p789_p10 = scmp.lt.s32.totalorder %s1091_s7, %s1142_s4 }
  0xe3   : > { %p790_p11 = scmp.lt.s32.totalorder %s788_s21, %s784_s12 }
  0xe4   : > { %p786_p7 = pnand %p785_p6, %p922_p4 }
  0xe5   : > { %p791_p12 = por %p790_p11, %p789_p10 }
  0xe6   : > { %p787_p9 = pneg %p786_p7 }
  0xe8   : > { %p792_p13 = pnand %p791_p12, %p787_p9 }
  0xea   : > { %795 = shalt.err (!%p792_p13)
}
  0xeb   : > { %s855_s26 = smov 128   ;;  %s856_s30 = smov 8  }
  0xec   : > { %699 = dma.vmem_to_hbm [thread:$0]  (%p922_p4), %s1086_s29, 256, %s1091_s7, %s1093_s8, %s855_s26, %s855_s26, %s856_s30  }
  0xed PF: > { %p705_p0 = scmp.ge.s32.totalorder %s846_s20, 2  ;;  %s588_s5 = sand.u32 1, %s826_s15  }
  0xee   : > { %s589_s6 = scalar_lea.sflag [#allocation3], %s588_s5 }
  0xef   : > { %p702_p1 = pnand %p705_p0, %p929_p8 }
  0xf1   : > { %p703_p2 = pneg %p702_p1 }
  0xf3   : > { %821 = dma.done.wait (%p703_p2), %s589_s6, 256  }
  0xf4   : > { %823 = vsyncadd (%p703_p2), %s589_s6, 4294967040  ;;  %s17_s20 = sadd.s32 1, %s846_s20   ;;  %s1147_s15 = smov %s830_s16 }
  0xf5   : > { %p14_p3 = scmp.ge.s32.totalorder %s17_s20, 4   ;;  %s1148_s16 = smov %s834_s17 }
  0xf6   : > { %s1149_s17 = smov %s935_s28  ;;  %s1150_s18 = smov %s842_s19 }
  0xf7   : > { %s1151_s19 = smov %s1153_s23  ;;  %16 = sbr.rel (!%p14_p3) target bundleno = 4 (0x4), region = 71 }
  0xfc   :  { %594 = vsyncpa [#allocation3], 1 }
  0xfd   :  { %596 = vsyncpa [#allocation3 + $0x1], 1 }

// kernel: tpu_custom_call.1
= control target key start
LH: loop header
LB: loop body
LE: loop exit
PB: predicated region body
PF: predicated region fallthrough
CT: control target
= control target key end

     0   :  { %8 = vsyncpa [#allocation3], 0  ;;  %s742_s0 = inlined_call_operand.vmem [shape: f32[2,16,15], index: 0, kind: input, shape index: {}]   ;;  %s743_s1 = inlined_call_operand.vmem [shape: f32[15,128], index: 1, kind: input, shape index: {}]   ;;  %s744_s2 = inlined_call_operand.vmem [shape: f32[16,128], index: 2, kind: input, shape index: {}]   ;;  %s745_s3 = inlined_call_operand.hbm [shape: f32[2,16,128], index: 3, kind: output, shape index: {}]  }
   0x1   :  { %10 = vsyncpa [#allocation3 + $0x1], 0  ;;  %s616_s12 = smov 0   ;;  %s618_s13 = smov 0  }
   0x2   :  { %s620_s14 = smov 0   ;;  %s622_s15 = smov 0  }
   0x3   :  { %s624_s16 = smov 0   ;;  %s626_s17 = smov 0  }
   0x4 LB: > { %s428_s18 = sadd.s32 4294967295, %s591_s17   ;;  %s429_s19 = sadd.s32 4294967294, %s591_s17   ;;  %s591_s17 = sphi %s626_s17, %s16_s17   ;;  %s587_s16 = sphi %s624_s16, %s752_s16   ;;  %s583_s15 = sphi %s622_s15, %s751_s15   ;;  %s579_s14 = sphi %s620_s14, %s750_s14   ;;  %s575_s13 = sphi %s618_s13, %s749_s13   ;;  %s571_s12 = sphi %s616_s12, %s748_s12  }
   0x5   : > { %s25_s20 = sadd.s32 1, %s587_s16  ;;  %s112_s21 = sadd.s32 1, %s579_s14 }
   0x6   : > { %p26_p0 = scmp.ge.s32.totalorder %s25_s20, 2  ;;  %p122_p1 = scmp.ne.s32.totalorder %s579_s14, %s575_s13 }
   0x7   : > { %p123_p2 = scmp.eq.s32.totalorder %s428_s18, 1  ;;  %p128_p3 = scmp.ne.s32.totalorder %s575_s13, %s571_s12 }
   0x8   : > { %s754_s20 = smov (%p26_p0, %s25_s20), 0  ;;  %p129_p5 = scmp.eq.s32.totalorder %s429_s19, 1 }
   0x9   : > { %p656_p4 = por %p123_p2, %p122_p1  ;;  %s107_s23 = ssub.s32 %s587_s16, %s754_s20 }
   0xa   : > { %p433_p6 = scmp.ge.s32.totalorder %s591_s17, 1  ;;  %p110_p7 = scmp.eq.s32.totalorder %s107_s23, 0 }
   0xb   : > { %p663_p8 = por %p129_p5, %p128_p3  ;;  %p172_p9 = scmp.lt.s32.totalorder %s591_s17, 3 }
   0xc   : > { %s669_s25 = scalar_select %p110_p7, %s579_s14, %s112_s21  }
   0xd   : > { %p173_p10 = pnand %p433_p6, %p172_p9 }
   0xe   : > { %p206_p11 = scmp.lt.s32.totalorder (!%p173_p10), %s583_s15, 1  ;;  %s202_s8 = sand.u32 (!%p173_p10), 1, %s575_s13  }
   0xf   : > { %176 = sbr.rel (%p173_p10) target bundleno = 237 (0xed), region = 32  ;;  %s434_s9 = sshll.u32 (!%p173_p10), %s202_s8, 4 }
  0x10   : > { %s204_s18 = scalar_lea.vmem (!%p173_p10), [#allocation2], %s434_s9  ;;  %s446_s21 = sshll.u32 (!%p173_p10), %s583_s15, 8 }
  0x11   : > { %s334_s19 = sshll.u32 (!%p173_p10), %s204_s18, 4  ;;  %s695_s29 = scalar_lea.hbm (!%p173_p10), %s745_s3, %s446_s21  ;;  %s690_s19 = int_to_ptr.vmem [resolvable:$true] %s334_s19 }
  0x14   : > { %v227_v0 = vld [vmem:[%s743_s1 + $0x8] sm:$0x7f]  ;;  %vm235_vm0 = vcmask 1046528   ;;  %v226_v1 = vld [vmem:[%s743_s1] sm:$0xff]  ;;  %s207_s30 = scalar_select %p206_p11, %s583_s15, 1  ;;  %vm228_vm1 = vcmask 121856  }
  0x15   : > { %451 = vmatprep.subr.msk.mxu0 %vm235_vm0, %v227_v0  ;;  %v223_v4 = vld [vmem:[%s744_s2 + $0x8] sm:$0xff]  ;;  %v222_v6 = vld [vmem:[%s744_s2] sm:$0xff]  ;;  %s697_s15 = scalar_lea.sflag [#allocation3], %s202_s8 }
  0x16   : > { %452 = vmatpush3.msk.msra.mxu0 %vm235_vm0, %v227_v0  ;;  %s445_s4 = sshll.u32 %s207_s30, 4  ;;  %s515_s30 = scalar_lea.vmem %s690_s19, 256 }
  0x17   : > { %453 = vmatprep.subr.mxu0 %v226_v1  ;;  %s213_s7 = scalar_lea.vmem %s742_s0, %s445_s4  ;;  %p516_p12 = scmp.ne.s32.totalorder %s690_s19, %s515_s30 }
  0x18   : > { %454 = vmatpush3.msra.mxu0 %v226_v1  ;;  %v224_v2 = vld [vmem:[%s213_s7] sm:$0xff]  ;;  %v225_v3 = vld [vmem:[%s213_s7 + $0x8] sm:$0xff]  ;;  %s593_s4 = smov [#allocation2]  }
  0x19   : > { %455 = vmatprep.mubr.msk.f32.mxu0 %vm228_vm1, %v224_v2  ;;  %p517_p13 = pnand %p516_p12, %p656_p4  ;;  %s519_s5 = sshll.u32 %s593_s4, 4  ;;  %s520_s5 = int_to_ptr.vmem [resolvable:$false] %s519_s5 }
  0x1a   : > { %456 = vmatmul.mubr.msk.f32.vlgmr.msra.gmra.mxu0 %vm228_vm1, %v225_v3  ;;  %s521_s6 = scalar_lea.vmem %s520_s5, 512  ;;  %p522_p1 = scmp.lt.s32.totalorder %s690_s19, %s520_s5 }
  0x1b   : > { %p518_p0 = pneg %p517_p13  ;;  %p523_p2 = scmp.lt.s32.totalorder %s521_s6, %s515_s30 }
  0x1d   : > { %p524_p3 = por %p523_p2, %p522_p1 }
  0x1f   : > { %p525_p5 = pnand %p524_p3, %p518_p0 }
  0xda   : > { %v457_v5 = vpop.f32.mrf.mxu0 }
  0xdb   : > { %v315_v7 = vadd.f32 %v457_v5, %v223_v4 }
  0xdc   : > { %v305_v8 = vpop.f32.mrf.mxu0 }
  0xdd   : > { %317 = vst [vmem:[%s204_s18 + $0x8] sm:$0xff] %v315_v7  ;;  %v314_v9 = vadd.f32 %v305_v8, %v222_v6 }
  0xdf   : > { %316 = vst [vmem:[%s204_s18] sm:$0xff] %v314_v9 }
  0xe0   : > { %528 = shalt.err (!%p525_p5)
}
  0xe1   : > { %s529_s7 = scalar_lea.hbm %s695_s29, 256  ;;  %s533_s10 = scalar_lea.hbm %s745_s3, 512 }
  0xe2   : > { %p530_p6 = scmp.ne.s32.totalorder %s695_s29, %s529_s7  ;;  %p534_p10 = scmp.lt.s32.totalorder %s695_s29, %s745_s3 }
  0xe3   : > { %p535_p11 = scmp.lt.s32.totalorder %s533_s10, %s529_s7 }
  0xe4   : > { %p531_p7 = pnand %p530_p6, %p656_p4 }
  0xe5   : > { %p536_p12 = por %p535_p11, %p534_p10 }
  0xe6   : > { %p532_p9 = pneg %p531_p7 }
  0xe8   : > { %p537_p13 = pnand %p536_p12, %p532_p9 }
  0xea   : > { %540 = shalt.err (!%p537_p13)
}
  0xeb   : > { %s594_s21 = smov 128   ;;  %s595_s23 = smov 8  }
  0xec   : > { %458 = dma.vmem_to_hbm [thread:$0]  (%p656_p4), %s690_s19, 256, %s695_s29, %s697_s15, %s594_s21, %s594_s21, %s595_s23  }
  0xed PF: > { %p464_p0 = scmp.ge.s32.totalorder %s591_s17, 2  ;;  %s349_s26 = sand.u32 1, %s571_s12  }
  0xee   : > { %s350_s27 = scalar_lea.sflag [#allocation3], %s349_s26 }
  0xef   : > { %p461_p1 = pnand %p464_p0, %p663_p8 }
  0xf1   : > { %p462_p2 = pneg %p461_p1 }
  0xf3   : > { %566 = dma.done.wait (%p462_p2), %s350_s27, 256  }
  0xf4   : > { %568 = vsyncadd (%p462_p2), %s350_s27, 4294967040  ;;  %s16_s17 = sadd.s32 1, %s591_s17   ;;  %s748_s12 = smov %s575_s13 }
  0xf5   : > { %p13_p3 = scmp.ge.s32.totalorder %s16_s17, 4   ;;  %s749_s13 = smov %s579_s14 }
  0xf6   : > { %s750_s14 = smov %s669_s25  ;;  %s751_s15 = smov %s587_s16 }
  0xf7   : > { %s752_s16 = smov %s754_s20  ;;  %15 = sbr.rel (!%p13_p3) target bundleno = 4 (0x4), region = 70 }
  0xfc   :  { %355 = vsyncpa [#allocation3], 1 }
  0xfd   :  { %357 = vsyncpa [#allocation3 + $0x1], 1 }

</bundles_post_ra>
